<compile_context>
chip_gen: v6e
topology: v6e:2x2x1
jax: 0.10.0
libtpu: 0.0.40
codegen_flags: <defaults>
</compile_context>

<pallas_src>
import functools

import jax
import jax.numpy as jnp
from jax.experimental import pallas as pl
from jax.experimental.pallas import tpu as pltpu


def _round_up(x, m):
    return (x + m - 1) // m * m


def _pow_weight(w, gamma):
    """w**gamma with small integer gamma specialised to VPU multiplies."""
    g = float(gamma)
    if g == 0.0:
        return jnp.ones_like(w)
    if g.is_integer() and 1.0 <= g <= 8.0:
        out = w
        for _ in range(int(g) - 1):
            out = out * w
        return out
    return w ** g


def _per_row_focal(logits, targets, alpha, gamma):
    """Per-row focal loss. logits (T, C) float, targets (T, 1) int32 -> (T, 1) f32."""
    logits = logits.astype(jnp.float32)
    t, c = logits.shape

    # Gather the target logit from the raw (upcast) logits via a lane iota, so
    # the shifted tile below only feeds the exp pass (one fewer live TxC temp).
    col_ids = jax.lax.broadcasted_iota(jnp.int32, (t, c), 1)            # (T, C)
    onehot = (col_ids == targets).astype(jnp.float32)                   # (T, C)
    tgt_logit = jnp.sum(logits * onehot, axis=-1, keepdims=True)        # (T, 1)

    row_max = jnp.max(logits, axis=-1, keepdims=True)                   # (T, 1)
    sum_exp = jnp.sum(jnp.exp(logits - row_max), axis=-1, keepdims=True)

    ce = jnp.log(sum_exp) + row_max - tgt_logit                         # (T, 1) >= 0
    pt = jnp.exp(-ce)
    w = jnp.maximum(1.0 - pt, 0.0)                                      # NaN-safe pow
    return alpha * _pow_weight(w, gamma) * ce


def _focal_sum_kernel(logits_ref, targets_ref, part_ref,
                      *, alpha, gamma, n_valid, tile_n):
    """reduce=True path: one (8,128)-broadcast partial sum per row tile."""
    i = pl.program_id(0)
    f = _per_row_focal(logits_ref[...], targets_ref[...], alpha, gamma)  # (T, 1)

    is_tail = (i + 1) * tile_n > n_valid  # only the (at most one) partial tile

    @pl.when(jnp.logical_not(is_tail))
    def _():
        part_ref[...] = jnp.broadcast_to(
            jnp.sum(f, axis=0, keepdims=True), part_ref.shape)

    @pl.when(is_tail)
    def _():
        # Rows >= n_valid were never DMA'd (partial edge block -> garbage):
        # mask with a select so NaN/Inf in those rows cannot poison the sum.
        row = jax.lax.broadcasted_iota(jnp.int32, f.shape, 0) + i * tile_n
        fm = jnp.where(row < n_valid, f, 0.0)
        part_ref[...] = jnp.broadcast_to(
            jnp.sum(fm, axis=0, keepdims=True), part_ref.shape)


def _focal_vec_kernel(logits_ref, targets_ref, floss_ref, *, alpha, gamma):
    """reduce=False path: per-sample losses (tail rows cropped by the masked
    partial-block writeback, so no in-kernel mask is needed)."""
    floss_ref[...] = _per_row_focal(
        logits_ref[...], targets_ref[...], alpha, gamma
    ).astype(floss_ref.dtype)


def focal_loss(logits, targets, *, alpha=1.0, gamma=2.0, reduce=True, tile_n=None):
    """logits: (N, C) float (f32/bf16, streamed in native dtype); targets: (N,) int.

    tile_n (optional) is an upper bound on the row tile; by default the tile is
    sized from a VMEM cost model for the current TPU generation.
    """
    n, c = logits.shape
    targets_2d = targets.reshape(n, 1).astype(jnp.int32)

    itemsize = jnp.dtype(logits.dtype).itemsize
    c_lanes = _round_up(c, 128)                 # lane padding inside VMEM
    row_align = 8 * max(1, 4 // itemsize)       # f32: 8 sublanes, bf16: 16, int8: 32

    # Per-row VMEM cost model (bytes): 2x double-buffered native logits tile,
    # ~4 full-tile f32 intermediates (upcast/shifted/exp/onehot upper bound),
    # and the (T,1) int32 targets block padded to 128 lanes (x2 buffers).
    # TODO(synk): lane-dense targets ((1, tile_n) blocks) and a lane-dense
    # reduce=False output, plus row-packing for C < 128, would recover the
    # remaining lane/VMEM efficiency; kept column layouts for lowering safety.
    bytes_per_row = 2 * c_lanes * itemsize + 4 * c_lanes * 4 + 2 * 128 * 4
    if not reduce:
        bytes_per_row += 2 * 128 * 4            # padded (T,1) f32 output block

    try:
        vmem_cap = int(pltpu.get_tpu_info().vmem_capacity_bytes)
    except Exception:
        vmem_cap = 64 * 1024 * 1024             # v7x-sized conservative fallback
    tile_budget = min(int(0.55 * vmem_cap), 40 * 1024 * 1024)

    max_rows = max(row_align,
                   (tile_budget // bytes_per_row) // row_align * row_align)
    want = int(tile_n) if tile_n is not None else 2048
    tile_n = min(want, max_rows, _round_up(n, row_align), 2048)
    tile_n = max(row_align, tile_n // row_align * row_align)

    n_tiles = pl.cdiv(n, tile_n)
    grid = (n_tiles,)

    vmem_limit = max(32 * 1024 * 1024, bytes_per_row * tile_n + 8 * 1024 * 1024)
    vmem_limit = min(vmem_limit,
                     max(vmem_cap - 8 * 1024 * 1024, 16 * 1024 * 1024))

    in_specs = [
        pl.BlockSpec((tile_n, c), lambda i: (i, 0)),
        pl.BlockSpec((tile_n, 1), lambda i: (i, 0)),
    ]
    params = pltpu.CompilerParams(dimension_semantics=("parallel",),
                                  vmem_limit_bytes=int(vmem_limit))

    if reduce:
        kernel = functools.partial(
            _focal_sum_kernel, alpha=float(alpha), gamma=float(gamma),
            n_valid=n, tile_n=tile_n)
        partials = pl.pallas_call(
            kernel,
            grid=grid,
            in_specs=in_specs,
            # Per-tile partial sums on a fully parallel axis (both v7x cores);
            # (8,128) lane-dense blocks keep the store path unmasked.
            out_specs=pl.BlockSpec((None, 8, 128), lambda i: (i, 0, 0)),
            out_shape=jax.ShapeDtypeStruct((n_tiles, 8, 128), jnp.float32),
            compiler_params=params,
        )(logits, targets_2d)
        # Final (tiny) tree reduction + mean in f32 outside the kernel.
        return jnp.sum(partials[:, 0, 0]) / n

    kernel = functools.partial(
        _focal_vec_kernel, alpha=float(alpha), gamma=float(gamma))
    f = pl.pallas_call(
        kernel,
        grid=grid,
        in_specs=in_specs,
        out_specs=pl.BlockSpec((tile_n, 1), lambda i: (i, 0)),
        out_shape=jax.ShapeDtypeStruct((n, 1), jnp.float32),
        compiler_params=params,
    )(logits, targets_2d)
    return f[:, 0]


def _focal_loss_ref(logits, targets, alpha=1.0, gamma=2.0, reduce=True):
    """Pure-JAX reference for verification."""
    logits = logits.astype(jnp.float32)
    lse = jax.nn.logsumexp(logits, axis=-1)
    tgt = jnp.take_along_axis(
        logits, targets[:, None].astype(jnp.int32), axis=-1)[:, 0]
    ce = lse - tgt
    pt = jnp.exp(-ce)
    w = jnp.maximum(1.0 - pt, 0.0)
    f = alpha * (w ** gamma) * ce
    return jnp.mean(f) if reduce else f


if __name__ == "__main__":
    key = jax.random.PRNGKey(0)
    k1, k2, k3, k4 = jax.random.split(key, 4)

    # --- Case 1: small classification-head shapes (8 rows, 32 classes), f32.
    N1, C1 = 8, 32
    logits1 = jax.random.normal(k1, (N1, C1), dtype=jnp.float32)
    targets1 = jax.random.randint(k2, (N1,), 0, C1, dtype=jnp.int32)

    out = jax.block_until_ready(focal_loss(logits1, targets1))
    ref = _focal_loss_ref(logits1, targets1)
    assert jnp.allclose(out, ref, rtol=1e-5, atol=1e-5), (out, ref)

    out_vec = jax.block_until_ready(focal_loss(logits1, targets1, reduce=False))
    ref_vec = _focal_loss_ref(logits1, targets1, reduce=False)
    assert jnp.allclose(out_vec, ref_vec, rtol=1e-5, atol=1e-5)

    # Non-integer gamma / non-default alpha path.
    out_g = jax.block_until_ready(
        focal_loss(logits1, targets1, alpha=0.25, gamma=1.5))
    ref_g = _focal_loss_ref(logits1, targets1, alpha=0.25, gamma=1.5)
    assert jnp.allclose(out_g, ref_g, rtol=1e-5, atol=1e-5), (out_g, ref_g)

    # --- Case 2: multi-tile grid with a masked (unpadded) tail block.
    N2, C2 = 300, 128
    logits2 = jax.random.normal(k3, (N2, C2), dtype=jnp.float32)
    targets2 = jax.random.randint(k4, (N2,), 0, C2, dtype=jnp.int32)

    out2 = jax.block_until_ready(focal_loss(logits2, targets2, tile_n=128))
    ref2 = _focal_loss_ref(logits2, targets2)
    assert jnp.allclose(out2, ref2, rtol=1e-5, atol=1e-5), (out2, ref2)

    out2_vec = jax.block_until_ready(
        focal_loss(logits2, targets2, reduce=False, tile_n=128))
    ref2_vec = _focal_loss_ref(logits2, targets2, reduce=False)
    assert jnp.allclose(out2_vec, ref2_vec, rtol=1e-5, atol=1e-5)

    # Auto tile size (single partial block covering all rows).
    out2_auto = jax.block_until_ready(focal_loss(logits2, targets2))
    assert jnp.allclose(out2_auto, ref2, rtol=1e-5, atol=1e-5), (out2_auto, ref2)

    # --- Case 3: bf16 logits streamed in native dtype (upcast inside kernel).
    logits_bf16 = logits2.astype(jnp.bfloat16)
    out3 = jax.block_until_ready(focal_loss(logits_bf16, targets2, tile_n=128))
    ref3 = _focal_loss_ref(logits_bf16, targets2)
    assert jnp.allclose(out3, ref3, rtol=1e-4, atol=1e-4), (out3, ref3)

    print("KERNEL_OK")
</pallas_src>

<mosaic_0001>
module attributes {stable_mosaic.version = 11 : i64} {
  func.func @_focal_sum_kernel(%arg0: i32, %arg1: memref<8x32xf32, #tpu.memory_space<vmem>>, %arg2: memref<8x1xi32, #tpu.memory_space<vmem>>, %arg3: memref<1x8x128xf32, #tpu.memory_space<vmem>>) attributes {dimension_semantics = [#tpu.dimension_semantics<parallel>], iteration_bounds = array<i64: 1>, scalar_prefetch = 0 : i64, scratch_operands = 0 : i64, tpu.core_type = #tpu.core_type<tc>, window_params = [{transform_indices = @transform_0, window_bounds = array<i64: 8, 32>}, {transform_indices = @transform_1, window_bounds = array<i64: 8, 1>}, {transform_indices = @transform_2, window_bounds = array<i64: 1, 8, 128>}]} {
    %c0 = arith.constant 0 : index
    %c0_0 = arith.constant 0 : index
    %0 = vector.load %arg1[%c0, %c0_0] : memref<8x32xf32, #tpu.memory_space<vmem>>, vector<8x32xf32>
    %c0_1 = arith.constant 0 : index
    %c0_2 = arith.constant 0 : index
    %1 = vector.load %arg2[%c0_1, %c0_2] : memref<8x1xi32, #tpu.memory_space<vmem>>, vector<8x1xi32>
    %2 = tpu.iota {dimensions = array<i32: 1>} : vector<8x32xi32>
    %3 = vector.broadcast %1 : vector<8x1xi32> to vector<8x32xi32>
    %4 = arith.cmpi eq, %2, %3 : vector<8x32xi32>
    %5 = arith.extui %4 : vector<8x32xi1> to vector<8x32xi32>
    %6 = arith.sitofp %5 : vector<8x32xi32> to vector<8x32xf32>
    %7 = arith.mulf %0, %6 : vector<8x32xf32>
    %cst = arith.constant dense<0.000000e+00> : vector<8xf32>
    %8 = vector.multi_reduction <add>, %7, %cst [1] : vector<8x32xf32> to vector<8xf32>
    %9 = vector.shape_cast %8 : vector<8xf32> to vector<8x1xf32>
    %cst_3 = arith.constant dense<0xFF800000> : vector<8xf32>
    %10 = vector.multi_reduction <maximumf>, %0, %cst_3 [1] : vector<8x32xf32> to vector<8xf32>
    %11 = vector.shape_cast %10 : vector<8xf32> to vector<8x1xf32>
    %12 = vector.broadcast %11 : vector<8x1xf32> to vector<8x32xf32>
    %13 = arith.subf %0, %12 : vector<8x32xf32>
    %14 = math.exp %13 : vector<8x32xf32>
    %cst_4 = arith.constant dense<0.000000e+00> : vector<8xf32>
    %15 = vector.multi_reduction <add>, %14, %cst_4 [1] : vector<8x32xf32> to vector<8xf32>
    %16 = vector.shape_cast %15 : vector<8xf32> to vector<8x1xf32>
    %17 = math.log %16 : vector<8x1xf32>
    %18 = arith.addf %17, %11 : vector<8x1xf32>
    %19 = arith.subf %18, %9 : vector<8x1xf32>
    %cst_5 = arith.constant 0.000000e+00 : f32
    %20 = vector.broadcast %cst_5 : f32 to vector<8x1xf32>
    %21 = arith.subf %20, %19 : vector<8x1xf32>
    %22 = math.exp %21 : vector<8x1xf32>
    %cst_6 = arith.constant 1.000000e+00 : f32
    %23 = vector.broadcast %cst_6 : f32 to vector<8x1xf32>
    %24 = arith.subf %23, %22 : vector<8x1xf32>
    %cst_7 = arith.constant 0.000000e+00 : f32
    %25 = vector.broadcast %cst_7 : f32 to vector<8x1xf32>
    %26 = arith.maximumf %24, %25 : vector<8x1xf32>
    %27 = arith.mulf %26, %26 : vector<8x1xf32>
    %cst_8 = arith.constant 1.000000e+00 : f32
    %28 = vector.broadcast %cst_8 : f32 to vector<8x1xf32>
    %29 = arith.mulf %28, %27 : vector<8x1xf32>
    %30 = arith.mulf %29, %19 : vector<8x1xf32>
    %c1_i32 = arith.constant 1 : i32
    %31 = arith.addi %arg0, %c1_i32 : i32
    %c8_i32 = arith.constant 8 : i32
    %32 = arith.muli %31, %c8_i32 : i32
    %c8_i32_9 = arith.constant 8 : i32
    %33 = arith.cmpi sgt, %32, %c8_i32_9 : i32
    %true = arith.constant true
    %34 = arith.xori %33, %true : i1
    %35 = arith.extui %34 : i1 to i32
    %c0_i32 = arith.constant 0 : i32
    %36 = arith.cmpi ne, %35, %c0_i32 : i32
    scf.if %36 {
      %cst_11 = arith.constant dense<0.000000e+00> : vector<1xf32>
      %39 = vector.multi_reduction <add>, %30, %cst_11 [0] : vector<8x1xf32> to vector<1xf32>
      %40 = vector.shape_cast %39 : vector<1xf32> to vector<1x1xf32>
      %41 = vector.shape_cast %40 : vector<1x1xf32> to vector<1x1xf32>
      %42 = vector.broadcast %41 : vector<1x1xf32> to vector<8x128xf32>
      %c0_12 = arith.constant 0 : index
      %c0_13 = arith.constant 0 : index
      %c0_14 = arith.constant 0 : index
      %43 = vector.load %arg3[%c0_12, %c0_13, %c0_14] : memref<1x8x128xf32, #tpu.memory_space<vmem>>, vector<1x8x128xf32>
      %44 = vector.shape_cast %43 : vector<1x8x128xf32> to vector<8x128xf32>
      %45 = vector.shape_cast %42 : vector<8x128xf32> to vector<1x8x128xf32>
      tpu.vector_store %arg3[%c0_12, %c0_13, %c0_14], %45 {strides = array<i32>} : memref<1x8x128xf32, #tpu.memory_space<vmem>>, vector<1x8x128xf32>,
    } else {
    }
    %37 = arith.extui %33 : i1 to i32
    %c0_i32_10 = arith.constant 0 : i32
    %38 = arith.cmpi ne, %37, %c0_i32_10 : i32
    scf.if %38 {
      %39 = tpu.iota {dimensions = array<i32: 0>} : vector<8x1xi32>
      %c8_i32_11 = arith.constant 8 : i32
      %40 = arith.muli %arg0, %c8_i32_11 : i32
      %41 = vector.broadcast %40 : i32 to vector<8x1xi32>
      %42 = arith.addi %39, %41 : vector<8x1xi32>
      %c8_i32_12 = arith.constant 8 : i32
      %43 = vector.broadcast %c8_i32_12 : i32 to vector<8x1xi32>
      %44 = arith.cmpi slt, %42, %43 : vector<8x1xi32>
      %cst_13 = arith.constant 0.000000e+00 : f32
      %45 = vector.broadcast %cst_13 : f32 to vector<8x1xf32>
      %46 = arith.select %44, %30, %45 : vector<8x1xi1>, vector<8x1xf32>
      %cst_14 = arith.constant dense<0.000000e+00> : vector<1xf32>
      %47 = vector.multi_reduction <add>, %46, %cst_14 [0] : vector<8x1xf32> to vector<1xf32>
      %48 = vector.shape_cast %47 : vector<1xf32> to vector<1x1xf32>
      %49 = vector.shape_cast %48 : vector<1x1xf32> to vector<1x1xf32>
      %50 = vector.broadcast %49 : vector<1x1xf32> to vector<8x128xf32>
      %c0_15 = arith.constant 0 : index
      %c0_16 = arith.constant 0 : index
      %c0_17 = arith.constant 0 : index
      %51 = vector.load %arg3[%c0_15, %c0_16, %c0_17] : memref<1x8x128xf32, #tpu.memory_space<vmem>>, vector<1x8x128xf32>
      %52 = vector.shape_cast %51 : vector<1x8x128xf32> to vector<8x128xf32>
      %53 = vector.shape_cast %50 : vector<8x128xf32> to vector<1x8x128xf32>
      tpu.vector_store %arg3[%c0_15, %c0_16, %c0_17], %53 {strides = array<i32>} : memref<1x8x128xf32, #tpu.memory_space<vmem>>, vector<1x8x128xf32>,
    } else {
    }
    return
  }
  func.func @transform_0(%arg0: i32) -> (i32, i32) {
    %c0_i32 = arith.constant 0 : i32
    %c0_i32_0 = arith.constant 0 : i32
    return %arg0, %c0_i32 : i32, i32
  }
  func.func @transform_1(%arg0: i32) -> (i32, i32) {
    %c0_i32 = arith.constant 0 : i32
    %c0_i32_0 = arith.constant 0 : i32
    return %arg0, %c0_i32 : i32, i32
  }
  func.func @transform_2(%arg0: i32) -> (i32, i32, i32) {
    %c0_i32 = arith.constant 0 : i32
    %c0_i32_0 = arith.constant 0 : i32
    %c0_i32_1 = arith.constant 0 : i32
    return %arg0, %c0_i32, %c0_i32_0 : i32, i32, i32
  }
}

</mosaic_0001>

<bundles_post_ra>
// kernel: tpu_custom_call.1
= control target key start
LH: loop header
LB: loop body
LE: loop exit
PB: predicated region body
PF: predicated region fallthrough
CT: control target
= control target key end

     0   :  { %vm23_vm0 = vcmask 261120   ;;  %s155_s0 = inlined_call_operand.vmem [shape: f32[8,32], index: 0, kind: input, shape index: {}]   ;;  %s156_s1 = inlined_call_operand.vmem [shape: s32[8,1], index: 1, kind: input, shape index: {}]   ;;  %s157_s2 = inlined_call_operand.hbm [shape: f32[1,8,128], index: 2, kind: output, shape index: {}]  }
   0x1   :  { %v12_v0 = vld [vmem:[%s155_s0] sm:$0xff] }
   0x2   :  { %7 = vsyncpa [#allocation3], 0  ;;  %v27_v1 = vsel %vm23_vm0, %v12_v0, -inf  ;;  %v125_v2 = vmov 0   ;;  %v13_v3 = vld [vmem:[%s156_s1] sm:$0xff]  ;;  %v14_v7 = vlaneseq  ;;  %v126_v10 = vmov 0.0  }
   0x3   :  { %96 = vset.pattern.permute.xlu0 %v125_v2  ;;  %s127_s0 = smov [#allocation2]  }
   0x4   :  { %28 = vmax.xlane.f32.xlu0 %v27_v1  ;;  %v15_v8 = vand.u32 127, %v14_v7  ;;  %s84_s1 = sshll.u32 %s127_s0, 4  ;;  %s85_s1 = int_to_ptr.vmem [resolvable:$true] %s84_s1 }
   0x5   :  { %s103_s13 = scalar_lea.vmem %s85_s1, 128  ;;  %p108_p1 = scmp.lt.s32.totalorder %s85_s1, %s85_s1 }
   0x6   :  { %p104_p0 = scmp.ne.s32.totalorder %s85_s1, %s103_s13  ;;  %p109_p2 = scmp.lt.s32.totalorder %s103_s13, %s103_s13 }
   0x8   :  { %p110_p3 = por %p109_p2, %p108_p1 }
   0xa   :  { %p111_p4 = pnand %p110_p3, %p104_p0 }
  0x1a   :  { %17 = vperm.xlu0 %96, %v13_v3  }
  0x8d   :  { %v29_v4 = vpop.xlane.xlu0 %28 }
  0x8e   :  { %v30_v5 = vsub.f32 %v12_v0, %v29_v4 }
  0x90   :  { %v31_v6 = vmul.f32 1.442695, %v30_v5 }
  0x92   :  { %97 = vpow2.f32 %v31_v6 }
  0x95   :  { %v18_v9 = vpop.permute.xlu0 %17 }
  0x96   :  { %vm19_vm1 = vcmp.eq.s32.totalorder %v15_v8, %v18_v9 }
  0x97   :  { %v92_v11 = vsel %vm19_vm1, 1.0, %v126_v10 }
  0x98   :  { %v22_v12 = vmul.f32 %v92_v11, %v12_v0 }
  0x9a   :  { %v24_v15 = vsel %vm23_vm0, %v22_v12, 0.0 }
  0x9f   :  { %v98_v13 = vpop.eup %97 }
  0xa0   :  { %v33_v14 = vsel %vm23_vm0, %v98_v13, 0.0 }
  0xa1   :  { %34 = vadd.xlane.f32.xlu1 %v33_v14 }
  0xa5   :  { %25 = vadd.xlane.f32.xlu1 %v24_v15 }
 0x12a   :  { %v35_v16 = vpop.xlane.xlu1 %34 }
 0x12b   :  { %99 = vlog2.f32 %v35_v16 }
 0x12e   :  { %v26_v19 = vpop.xlane.xlu1 %25 }
 0x138   :  { %v100_v17 = vpop.eup %99 }
 0x139   :  { %v37_v18 = vmul.f32 0.6931472, %v100_v17 }
 0x13b   :  { %v38_v20 = vadd.f32 %v37_v18, %v29_v4 }
 0x13d   :  { %v39_v21 = vsub.f32 %v38_v20, %v26_v19 }
 0x13f   :  { %v40_v22 = vsub.f32 0.0, %v39_v21 }
 0x141   :  { %v41_v23 = vmul.f32 1.442695, %v40_v22 }
 0x143   :  { %101 = vpow2.f32 %v41_v23 }
 0x150   :  { %v102_v24 = vpop.eup %101 }
 0x151   :  { %v43_v25 = vsub.f32 1.0, %v102_v24 }
 0x153   :  { %v44_v26 = vmax.f32 %v43_v25, 0.0 }
 0x155   :  { %v45_v27 = vmul.f32 %v44_v26, %v44_v26 }
 0x157   :  { %v46_v28 = vmul.f32 %v45_v27, %v39_v21 }
 0x159   :  { %v54_v29 = vrot.slane %v46_v28, 4 }
 0x15b   :  { %v55_v30 = vadd.f32 %v54_v29, %v46_v28 }
 0x15d   :  { %v56_v31 = vrot.slane %v55_v30, 2 }
 0x15f   :  { %v57_v32 = vadd.f32 %v56_v31, %v55_v30 }
 0x161   :  { %v58_v33 = vrot.slane %v57_v32, 1 }
 0x163   :  { %v59_v34 = vadd.f32 %v58_v33, %v57_v32 }
 0x165   :  { %60 = vst [vmem:[#allocation2] sm:$0xff] %v59_v34 }
 0x166   :  { %114 = shalt.err (!%p111_p4)
}
 0x167   :  { %87 = dma.vmem_to_hbm [thread:$0]  %s85_s1, 128, %s157_s2, [#allocation3]  }
 0x168   :  { %123 = dma.done.wait [#allocation3], 128  }
 0x169   :  { %124 = vsyncadd [#allocation3], 4294967168 }
 0x16a   :  { %91 = vsyncpa [#allocation3], 1 }

</bundles_post_ra>
